<compile_context>
chip_gen: v5e
topology: v5e:2x2
jax: 0.10.0
libtpu: 0.0.40
codegen_flags: <defaults>
</compile_context>

<pallas_src>
import functools
import math

import jax
import jax.numpy as jnp
from jax.experimental import pallas as pl
from jax.experimental.pallas import tpu as pltpu

LN_EPS = 1e-5  # nn.LayerNorm default


# ---------------------------------------------------------------------------
# Generation-aware budgets
# ---------------------------------------------------------------------------
def _tpu_vmem_capacity_bytes():
    try:
        info = pltpu.get_tpu_info()
        cap = getattr(info, "vmem_capacity_bytes", None)
        if cap:
            return int(cap)
    except Exception:
        pass
    return 64 * 1024 * 1024  # conservative fallback (v7x per-core VMEM)


_VMEM_CAP = _tpu_vmem_capacity_bytes()
_SMALL_VMEM = _VMEM_CAP <= 64 * 1024 * 1024          # v7x-class
VMEM_LIMIT = min(int(_VMEM_CAP * 3 // 4), 100 * 1024 * 1024)
MAX_ROW_TILE = 256 if _SMALL_VMEM else 512           # rows per grid step
MAX_FF_CHUNK = 1024 if _SMALL_VMEM else 2048         # filter-dim chunk in K3


def _row_tile(n, max_tile=MAX_ROW_TILE):
    """Largest multiple-of-8 divisor of n that is <= max_tile and, when
    possible, leaves >= 2 grid steps (so both v7x TensorCores get work)."""
    t = min(max_tile, n)
    t -= t % 8
    divisors = [c for c in range(t, 7, -8) if n % c == 0]
    if not divisors:
        return n
    for c in divisors:            # descending
        if n // c >= 2:
            return c
    return divisors[0]


def _mosaic_params(n_axes):
    return pltpu.CompilerParams(
        dimension_semantics=("parallel",) * n_axes,
        vmem_limit_bytes=VMEM_LIMIT,
    )


def _layernorm_f32(x_f32, gamma, beta):
    mean = jnp.mean(x_f32, axis=-1, keepdims=True)
    var = jnp.mean((x_f32 - mean) * (x_f32 - mean), axis=-1, keepdims=True)
    return (x_f32 - mean) * jax.lax.rsqrt(var + LN_EPS) * gamma + beta


# ---------------------------------------------------------------------------
# Kernel 1: LayerNorm + fused QKV projection -> Q (pre-scaled), K, V
# ---------------------------------------------------------------------------
def _ln_qkv_kernel(x_ref, g_ref, b_ref, w_ref, bias_ref,
                   q_ref, k_ref, v_ref, *, scale):
    d = x_ref.shape[1]
    x = x_ref[...].astype(jnp.float32)
    xn = _layernorm_f32(x, g_ref[...], b_ref[...])
    y = jnp.dot(xn.astype(w_ref.dtype), w_ref[...],
                preferred_element_type=jnp.float32) + bias_ref[...]
    # Fold 1/sqrt(Dh) into Q here: touches N*D elems instead of the SxS scores.
    q_ref[...] = (y[:, :d] * scale).astype(q_ref.dtype)
    k_ref[...] = y[:, d:2 * d].astype(k_ref.dtype)
    v_ref[...] = y[:, 2 * d:].astype(v_ref.dtype)


def ln_qkv(x, gamma, beta, w, bias, *, scale):
    N, D = x.shape
    tm = _row_tile(N)
    grid = (N // tm,)
    const = lambda i: (0, 0)
    row = lambda i: (i, 0)
    out_sd = jax.ShapeDtypeStruct((N, D), jnp.bfloat16)
    return pl.pallas_call(
        functools.partial(_ln_qkv_kernel, scale=scale),
        out_shape=(out_sd, out_sd, out_sd),
        grid=grid,
        in_specs=[
            pl.BlockSpec((tm, D), row),        # x rows (streamed)
            pl.BlockSpec((1, D), const),       # LN gamma (resident)
            pl.BlockSpec((1, D), const),       # LN beta  (resident)
            pl.BlockSpec((D, 3 * D), const),   # fused QKV weight (resident, bf16)
            pl.BlockSpec((1, 3 * D), const),   # fused QKV bias   (resident)
        ],
        out_specs=(
            pl.BlockSpec((tm, D), row),
            pl.BlockSpec((tm, D), row),
            pl.BlockSpec((tm, D), row),
        ),
        compiler_params=_mosaic_params(1),
        cost_estimate=pl.CostEstimate(
            flops=2 * N * D * 3 * D,
            transcendentals=N,
            bytes_accessed=4 * N * D + 2 * D * 3 * D + 4 * 3 * D
                           + 2 * 3 * N * D + 8 * D),
    )(x, gamma, beta, w, bias)


# ---------------------------------------------------------------------------
# Kernel 2: self-attention, one batch per grid step, all heads in-kernel,
#           heads merged into a lane-dense (S, D) output block.
# ---------------------------------------------------------------------------
def _attention_kernel(q_ref, k_ref, v_ref, o_ref, *, n_heads):
    S, D = q_ref.shape
    dh = D // n_heads
    q = q_ref[...]            # bf16, already scaled by 1/sqrt(dh)
    k = k_ref[...]
    v = v_ref[...]
    outs = []
    for h in range(n_heads):                      # static unroll over heads
        sl = slice(h * dh, (h + 1) * dh)
        s = jax.lax.dot_general(q[:, sl], k[:, sl],
                                (((1,), (1,)), ((), ())),
                                preferred_element_type=jnp.float32)
        s = s - jnp.max(s, axis=-1, keepdims=True)
        p = jnp.exp(s)
        p = p * pl.reciprocal(jnp.sum(p, axis=-1, keepdims=True), approx=True)
        outs.append(jnp.dot(p.astype(v.dtype), v[:, sl],
                            preferred_element_type=jnp.float32))
    # Single lane-dense store with heads already merged (no XLA transpose later).
    o_ref[...] = jnp.concatenate(outs, axis=-1).astype(o_ref.dtype)


def attention(q, k, v, batch, seq, n_heads):
    N, D = q.shape
    assert N == batch * seq
    row = lambda b: (b, 0)
    return pl.pallas_call(
        functools.partial(_attention_kernel, n_heads=n_heads),
        out_shape=jax.ShapeDtypeStruct((N, D), q.dtype),
        grid=(batch,),
        in_specs=[pl.BlockSpec((seq, D), row),
                  pl.BlockSpec((seq, D), row),
                  pl.BlockSpec((seq, D), row)],
        out_specs=pl.BlockSpec((seq, D), row),
        compiler_params=_mosaic_params(1),
        cost_estimate=pl.CostEstimate(
            flops=4 * batch * seq * seq * D,
            transcendentals=batch * n_heads * seq * seq,
            bytes_accessed=2 * 4 * N * D),
    )(q, k, v)


# ---------------------------------------------------------------------------
# Kernel 3: out-proj + residual + LN2 + FF (F-chunked) + residual, fused.
# ---------------------------------------------------------------------------
def _outproj_ff_kernel(attn_ref, x_ref, wo_ref, bo_ref, g_ref, b_ref,
                       w1_ref, b1_ref, w2_ref, b2_ref, o_ref, *, f_chunk):
    # attention output projection + residual with the raw block input
    res = (jnp.dot(attn_ref[...], wo_ref[...], preferred_element_type=jnp.float32)
           + bo_ref[...] + x_ref[...].astype(jnp.float32))
    # LayerNorm 2 in f32; feed the MXU in bf16
    rn = _layernorm_f32(res, g_ref[...], b_ref[...]).astype(w1_ref.dtype)
    # FF with the filter dimension chunked so the (tm, F) intermediate stays
    # bounded (matters on v7x's 64 MiB VMEM).
    F = w1_ref.shape[1]
    y = jnp.zeros_like(res)
    for f0 in range(0, F, f_chunk):
        f1 = min(f0 + f_chunk, F)
        h = (jnp.dot(rn, w1_ref[:, f0:f1], preferred_element_type=jnp.float32)
             + b1_ref[:, f0:f1])
        h = jnp.maximum(h, 0.0).astype(w2_ref.dtype)
        y = y + jnp.dot(h, w2_ref[f0:f1, :], preferred_element_type=jnp.float32)
    y = y + b2_ref[...]
    # dropout is identity at inference; residual uses the un-normalized res
    o_ref[...] = (y + res).astype(o_ref.dtype)


def outproj_ff(attn, x, wo, bo, gamma, beta, w1, b1, w2, b2):
    N, D = x.shape
    F = w1.shape[1]
    f_chunk = F if F <= MAX_FF_CHUNK else MAX_FF_CHUNK
    tm = _row_tile(N)
    grid = (N // tm,)
    const = lambda i: (0, 0)
    row = lambda i: (i, 0)
    return pl.pallas_call(
        functools.partial(_outproj_ff_kernel, f_chunk=f_chunk),
        out_shape=jax.ShapeDtypeStruct((N, D), x.dtype),
        grid=grid,
        in_specs=[
            pl.BlockSpec((tm, D), row),      # attention output (bf16, streamed)
            pl.BlockSpec((tm, D), row),      # residual input x (streamed)
            pl.BlockSpec((D, D), const),     # w_o (resident, bf16)
            pl.BlockSpec((1, D), const),     # b_o
            pl.BlockSpec((1, D), const),     # ln2 gamma
            pl.BlockSpec((1, D), const),     # ln2 beta
            pl.BlockSpec((D, F), const),     # w_ff1 (resident, bf16)
            pl.BlockSpec((1, F), const),     # b_ff1
            pl.BlockSpec((F, D), const),     # w_ff2 (resident, bf16)
            pl.BlockSpec((1, D), const),     # b_ff2
        ],
        out_specs=pl.BlockSpec((tm, D), row),
        compiler_params=_mosaic_params(1),
        cost_estimate=pl.CostEstimate(
            flops=2 * N * D * D + 4 * N * D * F,
            transcendentals=N,
            bytes_accessed=2 * N * D + 4 * N * D + 2 * (D * D + 2 * D * F)
                           + 4 * N * D + 4 * (3 * D + F)),
    )(attn, x, wo, bo, gamma, beta, w1, b1, w2, b2)


# ---------------------------------------------------------------------------
# Parameters + full forward
# ---------------------------------------------------------------------------
def init_params(key, input_size, n_heads, filter_size, hidden_size):
    assert hidden_size == input_size, "FF residual requires hidden_size == input_size"
    assert input_size % n_heads == 0
    D, F = input_size, filter_size
    ks = jax.random.split(key, 6)

    def xavier(k, shape):
        bound = math.sqrt(6.0 / (shape[0] + shape[1]))
        # weights stored pre-transposed (in, out) and in bf16 (MXU-native)
        return jax.random.uniform(k, shape, jnp.float32, -bound, bound
                                  ).astype(jnp.bfloat16)

    return {
        "n_heads": n_heads,
        "ln1_gamma": jnp.ones((1, D), jnp.float32),
        "ln1_beta": jnp.zeros((1, D), jnp.float32),
        "w_qkv": xavier(ks[0], (D, 3 * D)),
        "b_qkv": jnp.zeros((1, 3 * D), jnp.float32),
        "w_o": xavier(ks[1], (D, D)),
        "b_o": jnp.zeros((1, D), jnp.float32),
        "ln2_gamma": jnp.ones((1, D), jnp.float32),
        "ln2_beta": jnp.zeros((1, D), jnp.float32),
        "w_ff1": xavier(ks[2], (D, F)),
        "b_ff1": jax.random.uniform(ks[3], (1, F), jnp.float32,
                                    -1.0 / math.sqrt(D), 1.0 / math.sqrt(D)),
        "w_ff2": xavier(ks[4], (F, D)),
        "b_ff2": jax.random.uniform(ks[5], (1, D), jnp.float32,
                                    -1.0 / math.sqrt(F), 1.0 / math.sqrt(F)),
    }


def transformer_encoder_block(inputs, params, self_attention_mask=None):
    """inputs: (batch, seq, input_size) -> same shape."""
    # TODO(synk): masked attention not supported in the kernel yet.
    assert self_attention_mask is None
    # TODO(synk): MultiHeadAttention internals are not provided in the spec; a
    # standard fused-QKV + output-projection multi-head attention is assumed.
    B, S, D = inputs.shape
    n_heads = params["n_heads"]
    dh = D // n_heads
    x2d = inputs.reshape(B * S, D)

    # 1) LN1 + fused QKV projection; Q pre-scaled; Q/K/V emitted directly.
    q, k, v = ln_qkv(x2d, params["ln1_gamma"], params["ln1_beta"],
                     params["w_qkv"], params["b_qkv"],
                     scale=1.0 / math.sqrt(dh))

    # 2) attention: one batch per grid step, heads split/merged in-kernel.
    attn = attention(q, k, v, B, S, n_heads)           # (N, D), heads merged

    # 3) out-proj + residual + LN2 + FF + residual, all fused.
    out = outproj_ff(attn, x2d, params["w_o"], params["b_o"],
                     params["ln2_gamma"], params["ln2_beta"],
                     params["w_ff1"], params["b_ff1"],
                     params["w_ff2"], params["b_ff2"])
    return out.reshape(B, S, D)


# ---------------------------------------------------------------------------
# Pure-JAX reference (mirrors the PyTorch forward with the same bf16 mixed
# precision used at the MXU so the check can stay tight).
# ---------------------------------------------------------------------------
def _reference(inputs, params):
    f32, bf16 = jnp.float32, jnp.bfloat16
    B, S, D = inputs.shape
    H = params["n_heads"]
    dh = D // H

    def ln(x, g, b):
        m = jnp.mean(x, -1, keepdims=True)
        v = jnp.mean((x - m) ** 2, -1, keepdims=True)
        return (x - m) * jax.lax.rsqrt(v + LN_EPS) * g + b

    def mm(a, w):
        return jnp.dot(a.astype(bf16), w.astype(bf16),
                       preferred_element_type=f32)

    x = inputs.reshape(B * S, D).astype(f32)
    xn = ln(x, params["ln1_gamma"], params["ln1_beta"])
    qkv = mm(xn, params["w_qkv"]) + params["b_qkv"]
    scale = 1.0 / math.sqrt(dh)
    q = (qkv[:, :D] * scale).astype(bf16).reshape(B, S, H, dh)
    k = qkv[:, D:2 * D].astype(bf16).reshape(B, S, H, dh)
    v = qkv[:, 2 * D:].astype(bf16).reshape(B, S, H, dh)
    s = jnp.einsum("bqhd,bkhd->bhqk", q, k, preferred_element_type=f32)
    s = s - jnp.max(s, -1, keepdims=True)
    p = jnp.exp(s)
    p = p / jnp.sum(p, -1, keepdims=True)
    a = jnp.einsum("bhqk,bkhd->bqhd", p.astype(bf16), v,
                   preferred_element_type=f32)
    attn = a.reshape(B * S, D).astype(bf16)
    res = mm(attn, params["w_o"]) + params["b_o"] + x
    rn = ln(res, params["ln2_gamma"], params["ln2_beta"])
    h = jnp.maximum(mm(rn, params["w_ff1"]) + params["b_ff1"], 0.0)
    y = mm(h, params["w_ff2"]) + params["b_ff2"]
    return (y + res).reshape(B, S, D)


if __name__ == "__main__":
    batch_size, seq_length = 2, 8
    input_size, n_heads, filter_size, hidden_size = 32, 4, 64, 32

    key = jax.random.PRNGKey(0)
    k_params, k_inputs = jax.random.split(key)
    params = init_params(k_params, input_size, n_heads, filter_size, hidden_size)
    inputs = jax.random.normal(k_inputs, (batch_size, seq_length, input_size),
                               jnp.float32)

    out = transformer_encoder_block(inputs, params)
    out = jax.block_until_ready(out)

    ref = _reference(inputs, params)
    assert out.shape == (batch_size, seq_length, input_size)
    assert out.dtype == inputs.dtype
    max_err = float(jnp.max(jnp.abs(out - ref)))
    # bf16 MXU operands + approx EUP reciprocal in softmax => ~1e-3-level diffs.
    assert jnp.allclose(out, ref, atol=1e-2, rtol=1e-2), f"max abs err {max_err}"

    print("KERNEL_OK")
</pallas_src>

<mosaic_0001>
module attributes {stable_mosaic.version = 11 : i64} {
  func.func @_ln_qkv_kernel(%arg0: i32, %arg1: memref<8x32xf32, #tpu.memory_space<vmem>>, %arg2: memref<1x32xf32, #tpu.memory_space<vmem>>, %arg3: memref<1x32xf32, #tpu.memory_space<vmem>>, %arg4: memref<32x96xbf16, #tpu.memory_space<vmem>>, %arg5: memref<1x96xf32, #tpu.memory_space<vmem>>, %arg6: memref<8x32xbf16, #tpu.memory_space<vmem>>, %arg7: memref<8x32xbf16, #tpu.memory_space<vmem>>, %arg8: memref<8x32xbf16, #tpu.memory_space<vmem>>) attributes {dimension_semantics = [#tpu.dimension_semantics<parallel>], iteration_bounds = array<i64: 2>, scalar_prefetch = 0 : i64, scratch_operands = 0 : i64, tpu.core_type = #tpu.core_type<tc>, window_params = [{transform_indices = @transform_0, window_bounds = array<i64: 8, 32>}, {pipeline_mode = #tpu.pipeline_mode<synchronous>, transform_indices = @transform_1, window_bounds = array<i64: 1, 32>}, {pipeline_mode = #tpu.pipeline_mode<synchronous>, transform_indices = @transform_2, window_bounds = array<i64: 1, 32>}, {pipeline_mode = #tpu.pipeline_mode<synchronous>, transform_indices = @transform_3, window_bounds = array<i64: 32, 96>}, {pipeline_mode = #tpu.pipeline_mode<synchronous>, transform_indices = @transform_4, window_bounds = array<i64: 1, 96>}, {transform_indices = @transform_5, window_bounds = array<i64: 8, 32>}, {transform_indices = @transform_6, window_bounds = array<i64: 8, 32>}, {transform_indices = @transform_7, window_bounds = array<i64: 8, 32>}]} {
    %c0 = arith.constant 0 : index
    %c0_0 = arith.constant 0 : index
    %0 = vector.load %arg1[%c0, %c0_0] : memref<8x32xf32, #tpu.memory_space<vmem>>, vector<8x32xf32>
    %c0_1 = arith.constant 0 : index
    %c0_2 = arith.constant 0 : index
    %1 = vector.load %arg2[%c0_1, %c0_2] : memref<1x32xf32, #tpu.memory_space<vmem>>, vector<1x32xf32>
    %c0_3 = arith.constant 0 : index
    %c0_4 = arith.constant 0 : index
    %2 = vector.load %arg3[%c0_3, %c0_4] : memref<1x32xf32, #tpu.memory_space<vmem>>, vector<1x32xf32>
    %cst = arith.constant dense<0.000000e+00> : vector<8xf32>
    %3 = vector.multi_reduction <add>, %0, %cst [1] : vector<8x32xf32> to vector<8xf32>
    %4 = vector.shape_cast %3 : vector<8xf32> to vector<8x1xf32>
    %cst_5 = arith.constant 3.200000e+01 : f32
    %5 = vector.broadcast %cst_5 : f32 to vector<8x1xf32>
    %6 = arith.divf %4, %5 : vector<8x1xf32>
    %7 = vector.broadcast %6 : vector<8x1xf32> to vector<8x32xf32>
    %8 = arith.subf %0, %7 : vector<8x32xf32>
    %9 = vector.broadcast %6 : vector<8x1xf32> to vector<8x32xf32>
    %10 = arith.subf %0, %9 : vector<8x32xf32>
    %11 = arith.mulf %8, %10 : vector<8x32xf32>
    %cst_6 = arith.constant dense<0.000000e+00> : vector<8xf32>
    %12 = vector.multi_reduction <add>, %11, %cst_6 [1] : vector<8x32xf32> to vector<8xf32>
    %13 = vector.shape_cast %12 : vector<8xf32> to vector<8x1xf32>
    %cst_7 = arith.constant 3.200000e+01 : f32
    %14 = vector.broadcast %cst_7 : f32 to vector<8x1xf32>
    %15 = arith.divf %13, %14 : vector<8x1xf32>
    %16 = vector.broadcast %6 : vector<8x1xf32> to vector<8x32xf32>
    %17 = arith.subf %0, %16 : vector<8x32xf32>
    %cst_8 = arith.constant 9.99999974E-6 : f32
    %18 = vector.broadcast %cst_8 : f32 to vector<8x1xf32>
    %19 = arith.addf %15, %18 : vector<8x1xf32>
    %20 = math.rsqrt %19 : vector<8x1xf32>
    %21 = vector.broadcast %20 : vector<8x1xf32> to vector<8x32xf32>
    %22 = arith.mulf %17, %21 : vector<8x32xf32>
    %23 = vector.broadcast %1 : vector<1x32xf32> to vector<8x32xf32>
    %24 = arith.mulf %22, %23 : vector<8x32xf32>
    %25 = vector.broadcast %2 : vector<1x32xf32> to vector<8x32xf32>
    %26 = arith.addf %24, %25 : vector<8x32xf32>
    %27 = arith.truncf %26 : vector<8x32xf32> to vector<8x32xbf16>
    %c0_9 = arith.constant 0 : index
    %c0_10 = arith.constant 0 : index
    %28 = vector.load %arg4[%c0_9, %c0_10] : memref<32x96xbf16, #tpu.memory_space<vmem>>, vector<32x96xbf16>
    %cst_11 = arith.constant dense<0.000000e+00> : vector<8x96xf32>
    %29 = tpu.matmul %27, %28, %cst_11 {dimension_numbers = #tpu.dot_dimension_numbers<[1], [0], [0], [1], [0, 0, 1, 1], [], []>} : vector<8x32xbf16>, vector<32x96xbf16>, vector<8x96xf32> -> vector<8x96xf32>
    %c0_12 = arith.constant 0 : index
    %c0_13 = arith.constant 0 : index
    %30 = vector.load %arg5[%c0_12, %c0_13] : memref<1x96xf32, #tpu.memory_space<vmem>>, vector<1x96xf32>
    %31 = vector.broadcast %30 : vector<1x96xf32> to vector<8x96xf32>
    %32 = arith.addf %29, %31 : vector<8x96xf32>
    %33 = vector.extract_strided_slice %32 {offsets = [0, 0], sizes = [8, 32], strides = [1, 1]} : vector<8x96xf32> to vector<8x32xf32>
    %cst_14 = arith.constant 0.353553385 : f32
    %34 = vector.broadcast %cst_14 : f32 to vector<8x32xf32>
    %35 = arith.mulf %33, %34 : vector<8x32xf32>
    %36 = arith.truncf %35 : vector<8x32xf32> to vector<8x32xbf16>
    %c0_15 = arith.constant 0 : index
    %c0_16 = arith.constant 0 : index
    %37 = vector.load %arg6[%c0_15, %c0_16] : memref<8x32xbf16, #tpu.memory_space<vmem>>, vector<8x32xbf16>
    tpu.vector_store %arg6[%c0_15, %c0_16], %36 {strides = array<i32>} : memref<8x32xbf16, #tpu.memory_space<vmem>>, vector<8x32xbf16>,
    %38 = vector.extract_strided_slice %32 {offsets = [0, 32], sizes = [8, 32], strides = [1, 1]} : vector<8x96xf32> to vector<8x32xf32>
    %39 = arith.truncf %38 : vector<8x32xf32> to vector<8x32xbf16>
    %c0_17 = arith.constant 0 : index
    %c0_18 = arith.constant 0 : index
    %40 = vector.load %arg7[%c0_17, %c0_18] : memref<8x32xbf16, #tpu.memory_space<vmem>>, vector<8x32xbf16>
    tpu.vector_store %arg7[%c0_17, %c0_18], %39 {strides = array<i32>} : memref<8x32xbf16, #tpu.memory_space<vmem>>, vector<8x32xbf16>,
    %41 = vector.extract_strided_slice %32 {offsets = [0, 64], sizes = [8, 32], strides = [1, 1]} : vector<8x96xf32> to vector<8x32xf32>
    %42 = arith.truncf %41 : vector<8x32xf32> to vector<8x32xbf16>
    %c0_19 = arith.constant 0 : index
    %c0_20 = arith.constant 0 : index
    %43 = vector.load %arg8[%c0_19, %c0_20] : memref<8x32xbf16, #tpu.memory_space<vmem>>, vector<8x32xbf16>
    tpu.vector_store %arg8[%c0_19, %c0_20], %42 {strides = array<i32>} : memref<8x32xbf16, #tpu.memory_space<vmem>>, vector<8x32xbf16>,
    return
  }
  func.func @transform_0(%arg0: i32) -> (i32, i32) {
    %c0_i32 = arith.constant 0 : i32
    %c0_i32_0 = arith.constant 0 : i32
    return %arg0, %c0_i32 : i32, i32
  }
  func.func @transform_1(%arg0: i32) -> (i32, i32) {
    %c0_i32 = arith.constant 0 : i32
    %c0_i32_0 = arith.constant 0 : i32
    %c0_i32_1 = arith.constant 0 : i32
    return %c0_i32, %c0_i32_0 : i32, i32
  }
  func.func @transform_2(%arg0: i32) -> (i32, i32) {
    %c0_i32 = arith.constant 0 : i32
    %c0_i32_0 = arith.constant 0 : i32
    %c0_i32_1 = arith.constant 0 : i32
    return %c0_i32, %c0_i32_0 : i32, i32
  }
  func.func @transform_3(%arg0: i32) -> (i32, i32) {
    %c0_i32 = arith.constant 0 : i32
    %c0_i32_0 = arith.constant 0 : i32
    %c0_i32_1 = arith.constant 0 : i32
    return %c0_i32, %c0_i32_0 : i32, i32
  }
  func.func @transform_4(%arg0: i32) -> (i32, i32) {
    %c0_i32 = arith.constant 0 : i32
    %c0_i32_0 = arith.constant 0 : i32
    %c0_i32_1 = arith.constant 0 : i32
    return %c0_i32, %c0_i32_0 : i32, i32
  }
  func.func @transform_5(%arg0: i32) -> (i32, i32) {
    %c0_i32 = arith.constant 0 : i32
    %c0_i32_0 = arith.constant 0 : i32
    return %arg0, %c0_i32 : i32, i32
  }
  func.func @transform_6(%arg0: i32) -> (i32, i32) {
    %c0_i32 = arith.constant 0 : i32
    %c0_i32_0 = arith.constant 0 : i32
    return %arg0, %c0_i32 : i32, i32
  }
  func.func @transform_7(%arg0: i32) -> (i32, i32) {
    %c0_i32 = arith.constant 0 : i32
    %c0_i32_0 = arith.constant 0 : i32
    return %arg0, %c0_i32 : i32, i32
  }
}

</mosaic_0001>

<bundles_post_ra>
// kernel: tpu_custom_call.1
= control target key start
LH: loop header
LB: loop body
LE: loop exit
PB: predicated region body
PF: predicated region fallthrough
CT: control target
= control target key end

     0   :  { %s1234_s0 = inlined_call_operand.hbm [shape: f32[16,32], index: 0, kind: input, shape index: {}]   ;;  %s1235_s1 = inlined_call_operand.hbm [shape: f32[1,32], index: 1, kind: input, shape index: {}]   ;;  %s1236_s2 = inlined_call_operand.vmem [shape: f32[1,32], index: 2, kind: input, shape index: {}]   ;;  %s1237_s3 = inlined_call_operand.hbm [shape: bf16[32,96], index: 3, kind: input, shape index: {}]   ;;  %s1238_s4 = inlined_call_operand.vmem [shape: f32[1,96], index: 4, kind: input, shape index: {}]   ;;  %s1239_s5 = inlined_call_operand.hbm [shape: bf16[16,32], index: 5, kind: output, shape index: {0}]   ;;  %s1240_s6 = inlined_call_operand.hbm [shape: bf16[16,32], index: 6, kind: output, shape index: {1}]   ;;  %s1241_s7 = inlined_call_operand.hbm [shape: bf16[16,32], index: 7, kind: output, shape index: {2}]  }
   0x1   :  { %1243 = sst [smem:[#allocation16_spill]] %s1234_s0 }
   0x2   :  { %1244 = sst [smem:[#allocation17_spill]] %s1235_s1 }
   0x3   :  { %13 = vsyncpa [#allocation3], 0 }
   0x4   :  { %15 = vsyncpa [#allocation3 + $0x1], 0 }
   0x5   :  { %16 = vsyncpa [#allocation6], 0 }
   0x6   :  { %17 = vsyncpa [#allocation4], 0 }
   0x7   :  { %19 = vsyncpa [#allocation4 + $0x1], 0 }
   0x8   :  { %20 = vsyncpa [#allocation10], 0 }
   0x9   :  { %22 = vsyncpa [#allocation10 + $0x1], 0  ;;  %s1035_s24 = smov 0   ;;  %s1037_s25 = smov 0  }
   0xa   :  { %s1039_s26 = smov 0   ;;  %s1041_s27 = smov 0  }
   0xb LB: > { %s1056_s28 = sadd.s32 4294967295, %s986_s27   ;;  %s1242_s29 = sadd.s32 4294967294, %s986_s27   ;;  %s986_s27 = sphi %s1041_s27, %s1257_s27   ;;  %s982_s26 = sphi %s1039_s26, %s1256_s26   ;;  %s978_s25 = sphi %s1037_s25, %s1255_s25   ;;  %s974_s24 = sphi %s1035_s24, %s1254_s24  }
   0xc   : > { %p48_p0 = scmp.ne.s32.totalorder %s978_s25, %s974_s24  ;;  %p49_p1 = scmp.eq.s32.totalorder %s1056_s28, 0 }
   0xd   : > { %p156_p2 = scmp.eq.s32.totalorder %s1056_s28, 1  ;;  %p162_p3 = scmp.eq.s32.totalorder %s1242_s29, 1 }
   0xe   : > { %p1067_p4 = por %p49_p1, %p48_p0  ;;  %p645_p5 = scmp.ge.s32.totalorder %s986_s27, 1 }
   0xf   : > { %p1072_p6 = por %p162_p3, %p48_p0  ;;  %p221_p7 = scmp.lt.s32.totalorder %s986_s27, 3 }
  0x10   : > { %s1247_s1 = sld [smem:[#allocation17_spill]]  ;;  %s988_s13 = smov [#allocation5]  }
  0x11   : > { %p1080_p8 = pnand %p645_p5, %p221_p7  ;;  %s235_s14 = sshll.u32 %s988_s13, 4  ;;  %s236_s14 = int_to_ptr.vmem [resolvable:$true] %s235_s14 }
  0x12   : > { %s247_s17 = sshll.u32 %s1237_s3, 4  ;;  %s989_s18 = smov [#allocation7]   ;;  %s248_s17 = int_to_ptr.hbm [resolvable:$true] %s247_s17 }
  0x13   : > { %p693_p10 = pneg %p1080_p8  ;;  %s249_s19 = sshll.u32 %s989_s18, 4  ;;  %s250_s19 = int_to_ptr.vmem [resolvable:$true] %s249_s19 }
  0x14   : > { %s990_s20 = smov 64   ;;  %s991_s21 = smov 4  }
  0x15   : > { %p694_p11 = pnand %p693_p10, %p49_p1  ;;  %s1093_s22 = sadd.s32 1, %s986_s27  }
  0x16   : > { %s233_s11 = sshll.u32 %s1247_s1, 4  ;;  %s32_s23 = ssub.s32 %s986_s27, %s1093_s22  ;;  %s234_s11 = int_to_ptr.hbm [resolvable:$true] %s233_s11 }
  0x17   : > { %696 = dma.hbm_to_vmem [thread:$0]  (!%p694_p11), %s234_s11, 16, %s236_s14, [#allocation6]  }
  0x18   : > { %699 = dma.hbm_to_vmem [thread:$0]  (!%p694_p11), %s248_s17, 256, %s250_s19, [#allocation6], %s990_s20, %s990_s20, %s991_s21  }
  0x19   : > { %p33_p12 = scmp.eq.s32.totalorder %s32_s23, 0  ;;  %s35_s9 = sadd.s32 1, %s982_s26 }
  0x1a   : > { %p42_p13 = scmp.ne.s32.totalorder %s982_s26, %s978_s25  ;;  %p43_p0 = scmp.eq.s32.totalorder %s986_s27, 0 }
  0x1b   : > { %s1102_s10 = scalar_select %p33_p12, %s982_s26, %s35_s9  }
  0x1c   : > { %p44_p3 = por %p43_p0, %p42_p13  ;;  %p1106_p5 = por %p156_p2, %p42_p13 }
  0x1d   : > { %p716_p7 = scmp.lt.s32.totalorder %s986_s27, 2  ;;  %s266_s11 = sand.u32 1, %s982_s26  }
  0x1e   : > { %s649_s14 = sshll.u32 %s266_s11, 3  ;;  %s650_s15 = sshll.u32 %s986_s27, 3 }
  0x1f   : > { %s1250_s0 = sld [smem:[#allocation16_spill]]  ;;  %s270_s19 = scalar_lea.vmem [#allocation2], %s649_s14 }
  0x20   : > { %s278_s20 = sshll.u32 %s270_s19, 4  ;;  %p1116_p10 = pnand %p716_p7, %p44_p3  ;;  %s279_s20 = int_to_ptr.vmem [resolvable:$true] %s278_s20 }
  0x21   : > { %s267_s9 = scalar_lea.sflag [#allocation3], %s266_s11 }
  0x22   : > { %p830_p11 = pneg %p1116_p10 }
  0x25   : > { %s274_s18 = scalar_lea.hbm %s1250_s0, %s650_s15  ;;  %s833_s16 = scalar_lea.hbm %s1250_s0, 16 }
  0x26   : > { %s276_s21 = sshll.u32 %s274_s18, 4  ;;  %s277_s21 = int_to_ptr.hbm [resolvable:$true] %s276_s21 }
  0x27   : > { %s826_s29 = sshra.s32 %s277_s21, 4  ;;  %s827_s29 = int_to_ptr.hbm [resolvable:$true] %s826_s29 }
  0x28   : > { %s828_s1 = scalar_lea.hbm %s827_s29, 8  ;;  %p834_p0 = scmp.lt.s32.totalorder %s827_s29, %s1250_s0 }
  0x29   : > { %p829_p2 = scmp.ne.s32.totalorder %s827_s29, %s828_s1  ;;  %p835_p3 = scmp.lt.s32.totalorder %s833_s16, %s828_s1 }
  0x2b   : > { %p831_p12 = pnand %p830_p11, %p829_p2  ;;  %p836_p7 = por %p835_p3, %p834_p0 }
  0x2d   : > { %p832_p13 = pneg %p831_p12 }
  0x2f   : > { %p837_p9 = pnand %p836_p7, %p832_p13 }
  0x31   : > { %840 = shalt.err (!%p837_p9)
}
  0x32   : > { %703 = dma.hbm_to_vmem [thread:$0]  (!%p1116_p10), %s277_s21, 128, %s279_s20, %s267_s9  }
  0x33   : > { %287 = sbr.rel (%p1080_p8) target bundleno = 591 (0x24f), region = 40  ;;  %s1133_s11 = sand.u32 (!%p1080_p8), 1, %s978_s25  }
  0x34   : > { %s652_s19 = sshll.u32 (!%p1080_p8), %s1133_s11, 3  ;;  %s290_s15 = scalar_lea.sflag (!%p1080_p8), [#allocation3], %s1133_s11 }
  0x35   : > { %s293_s14 = scalar_lea.vmem (!%p1080_p8), [#allocation2], %s652_s19 }
  0x38   : > { %957 = dma.done.wait (%p1067_p4), %s290_s15, 128  }
  0x39   : > { %959 = vsyncadd (%p1067_p4), %s290_s15, 4294967168 }
  0x3a   : > { %961 = dma.done.wait (%p49_p1), [#allocation6], 272  }
  0x3b   : > { %963 = vsyncadd (%p49_p1), [#allocation6], 4294967024  ;;  %vm349_vm0 = vcmask 261120   ;;  %v346_v0 = vld [vmem:[%s293_s14] sm:$0xff]  ;;  %v992_v2 = vmov 32.0   ;;  %v675_v15 = vld [vmem:[#allocation7] sm:$0xff] }
  0x3c   : > { %v350_v1 = vsel %vm349_vm0, %v346_v0, 0.0  ;;  %762 = vrcp.f32 %v992_v2  ;;  %v676_v14 = vld [vmem:[#allocation7 + $0x8] sm:$0xff]  ;;  %v759_v25 = vld [vmem:[#allocation5] ss:$0 sm:$0xff]  ;;  %s1155_s20 = sshll.u32 %s1133_s11, 2  ;;  %s1158_s21 = sshll.u32 %s1056_s28, 2 }
  0x3d   : > { %351 = vadd.xlane.f32.xlu0 %v350_v1  ;;  %417 = vmatpush.bf16.msra.mxu0 %v676_v14  ;;  %v760_v28 = vld [vmem:[%s1236_s2] ss:$0 sm:$0xff]  ;;  %s459_s16 = scalar_lea.hbm %s1239_s5, %s1158_s21  ;;  %s330_s17 = scalar_lea.vmem [#allocation8], %s1155_s20  ;;  %vm426_vm5 = vcmask 257024  }
  0x3e   : > { %v761_v32 = vld [vmem:[%s1238_s4] ss:$0 sm:$0xff]  ;;  %s461_s18 = sshll.u32 %s330_s17, 4  ;;  %s463_s19 = sshll.u32 %s459_s16, 4  ;;  %s462_s18 = int_to_ptr.vmem [resolvable:$true] %s461_s18  ;;  %s464_s19 = int_to_ptr.hbm [resolvable:$true] %s463_s19 }
  0x3f   : > { %s993_s15 = smov 96   ;;  %s439_s14 = scalar_lea.sflag [#allocation4], %s1133_s11 }
  0x40   : > { %s870_s1 = sshra.s32 %s464_s19, 4  ;;  %s876_s23 = scalar_lea.hbm %s1239_s5, 8  ;;  %s871_s1 = int_to_ptr.hbm [resolvable:$true] %s870_s1 }
  0x41   : > { %418 = vmatpush.bf16.msra.mxu0 %v675_v15  ;;  %s872_s29 = scalar_lea.hbm %s871_s1, 4  ;;  %p877_p9 = scmp.lt.s32.totalorder %s871_s1, %s1239_s5 }
  0x42   : > { %v763_v3 = vpop.eup %762  ;;  %p873_p1 = scmp.ne.s32.totalorder %s871_s1, %s872_s29  ;;  %p878_p10 = scmp.lt.s32.totalorder %s876_s23, %s872_s29 }
  0x43   : > { %v354_v4 = vmul.f32 32.0, %v763_v3  ;;  %vm358_vm1 = vweird.f32 %v763_v3 }
  0x44   : > { %p874_p4 = pnand %p873_p1, %p1106_p5  ;;  %p879_p2 = por %p878_p10, %p877_p9 }
  0x45   : > { %v355_v5 = vsub.f32 1.0, %v354_v4 }
  0x46   : > { %p875_p8 = pneg %p874_p4 }
  0x47   : > { %v356_v6 = vmul.f32 %v763_v3, %v355_v5 }
  0x48   : > { %p880_p11 = pnand %p879_p2, %p875_p8 }
  0x49   : > { %v357_v7 = vadd.f32 %v763_v3, %v356_v6 }
  0x4b   : > { %v359_v8 = vsel %vm358_vm1, %v763_v3, %v357_v7 }
  0xb0   : > { %v352_v9 = vpop.xlane.xlu0 %351 }
  0xb1   : > { %v360_v10 = vmul.f32 %v359_v8, %v352_v9 }
  0xb3   : > { %v361_v11 = vsub.f32 %v346_v0, %v360_v10 }
  0xb5   : > { %v362_v12 = vmul.f32 %v361_v11, %v361_v11 }
  0xb7   : > { %v363_v13 = vsel %vm349_vm0, %v362_v12, 0.0 }
  0xb8   : > { %364 = vadd.xlane.f32.xlu0 %v363_v13 }
 0x12b   : > { %v365_v16 = vpop.xlane.xlu0 %364 }
 0x12c   : > { %v366_v17 = vmul.f32 %v365_v16, %v359_v8 }
 0x12e   : > { %v367_v18 = vadd.f32 1e-05, %v366_v17 }
 0x130   : > { %764 = vrsqrt.f32 %v367_v18  ;;  %vm374_vm3 = vweird.f32 %v367_v18 }
 0x136   : > { %v765_v19 = vpop.eup %764 }
 0x137   : > { %v369_v20 = vmul.f32 %v765_v19, %v367_v18  ;;  %vm375_vm2 = vweird.f32 %v765_v19 }
 0x138   : > { %vm376_vm4 = vmor %vm374_vm3, %vm375_vm2 }
 0x139   : > { %v370_v21 = vmul.f32 %v765_v19, %v369_v20 }
 0x13b   : > { %v371_v22 = vmul.f32 0.5, %v370_v21 }
 0x13d   : > { %v372_v23 = vsub.f32 1.5, %v371_v22 }
 0x13f   : > { %v373_v24 = vmul.f32 %v765_v19, %v372_v23 }
 0x141   : > { %v377_v26 = vsel %vm376_vm4, %v765_v19, %v373_v24 }
 0x142   : > { %v378_v27 = vmul.f32 %v377_v26, %v361_v11 }
 0x144   : > { %v382_v29 = vmul.f32 %v759_v25, %v378_v27 }
 0x146   : > { %v386_v30 = vadd.f32 %v760_v28, %v382_v29 }
 0x148   : > { %v387_v31 = vpack.c.bf16 %v386_v30, %v386_v30 }
 0x14a   : > { %666 = vmatmul.msk.bf16.vlgmr.msra.gmra.mxu0 %vm349_vm0, %v387_v31 }
 0x1c7   : > { %v420_v33 = vpop.f32.mrf.mxu0 }
 0x1c8   : > { %v421_v34 = vadd.f32 %v761_v32, %v420_v33 }
 0x1ca   : > { %v424_v35 = vmul.f32 0.35355338, %v421_v34  ;;  %v428_v36 = vpack.c.bf16 %v421_v34, %v421_v34 }
 0x1cc   : > { %v425_v37 = vpack.c.bf16 %v424_v35, %v424_v35  ;;  %430 = vrot.lane.b32.xlu1 %v428_v36, %s993_s15 }
 0x1ce   : > { %427 = vst.msk [vmem:[%s330_s17] sm:$0xf] %vm426_vm5, %v425_v37 }
 0x1cf   : > { %v422_v38 = vpop.f32.mrf.mxu0 }
 0x1d0   : > { %883 = shalt.err (!%p880_p11)
}
 0x1d1   : > { %687 = dma.vmem_to_hbm [thread:$0]  (%p1106_p5), %s462_s18, 64, %s464_s19, %s439_s14  }
 0x1d2   : > { %s994_s11 = smov 64   ;;  %s473_s30 = scalar_lea.hbm %s1240_s6, %s1158_s21 }
 0x1d3   : > { %s443_s12 = sand.u32 1, %s1056_s28   ;;  %s337_s1 = scalar_lea.vmem [#allocation9], %s1155_s20 }
 0x1d4   : > { %434 = vrot.lane.b32.xlu1 %v428_v36, %s994_s11  ;;  %s475_s29 = sshll.u32 %s337_s1, 4  ;;  %s477_s23 = sshll.u32 %s473_s30, 4  ;;  %s476_s29 = int_to_ptr.vmem [resolvable:$true] %s475_s29  ;;  %s478_s23 = int_to_ptr.hbm [resolvable:$true] %s477_s23 }
 0x1d5   : > { %s487_s18 = scalar_lea.hbm %s1241_s7, %s1158_s21  ;;  %s1188_s19 = scalar_lea.sflag [#allocation10], %s443_s12 }
 0x1d6   : > { %s898_s14 = sshra.s32 %s478_s23, 4  ;;  %s904_s15 = scalar_lea.hbm %s1240_s6, 8  ;;  %s899_s14 = int_to_ptr.hbm [resolvable:$true] %s898_s14 }
 0x1d7   : > { %s900_s11 = scalar_lea.hbm %s899_s14, 4  ;;  %p905_p3 = scmp.lt.s32.totalorder %s899_s14, %s1240_s6 }
 0x1d8   : > { %p901_p12 = scmp.ne.s32.totalorder %s899_s14, %s900_s11  ;;  %p906_p7 = scmp.lt.s32.totalorder %s904_s15, %s900_s11 }
 0x1da   : > { %p902_p13 = pnand %p901_p12, %p1106_p5  ;;  %p907_p1 = por %p906_p7, %p905_p3 }
 0x1dc   : > { %p903_p0 = pneg %p902_p13 }
 0x1de   : > { %p908_p4 = pnand %p907_p1, %p903_p0 }
 0x23e   : > { %v431_v39 = vpop.permute.xlu1 %430 }
 0x23f   : > { %433 = vst.msk [vmem:[%s337_s1] sm:$0xf] %vm426_vm5, %v431_v39 }
 0x240   : > { %911 = shalt.err (!%p908_p4)
}
 0x241   : > { %688 = dma.vmem_to_hbm [thread:$0]  (%p1106_p5), %s476_s29, 64, %s478_s23, %s1188_s19  }
 0x242   : > { %s344_s21 = scalar_lea.vmem [#allocation11], %s1155_s20  ;;  %s491_s1 = sshll.u32 %s487_s18, 4  ;;  %s492_s1 = int_to_ptr.hbm [resolvable:$true] %s491_s1 }
 0x243   : > { %s489_s12 = sshll.u32 %s344_s21, 4  ;;  %s926_s0 = sshra.s32 %s492_s1, 4  ;;  %s490_s12 = int_to_ptr.vmem [resolvable:$true] %s489_s12  ;;  %s927_s0 = int_to_ptr.hbm [resolvable:$true] %s926_s0 }
 0x244   : > { %s928_s9 = scalar_lea.hbm %s927_s0, 4  ;;  %s932_s11 = scalar_lea.hbm %s1241_s7, 8 }
 0x245   : > { %p929_p8 = scmp.ne.s32.totalorder %s927_s0, %s928_s9  ;;  %p933_p2 = scmp.lt.s32.totalorder %s927_s0, %s1241_s7 }
 0x246   : > { %v435_v40 = vpop.permute.xlu1 %434  ;;  %p934_p11 = scmp.lt.s32.totalorder %s932_s11, %s928_s9 }
 0x247   : > { %437 = vst.msk [vmem:[%s344_s21] sm:$0xf] %vm426_vm5, %v435_v40  ;;  %p930_p9 = pnand %p929_p8, %p1106_p5 }
 0x248   : > { %p935_p12 = por %p934_p11, %p933_p2 }
 0x249   : > { %p931_p10 = pneg %p930_p9 }
 0x24b   : > { %p936_p13 = pnand %p935_p12, %p931_p10 }
 0x24d   : > { %939 = shalt.err (!%p936_p13)
}
 0x24e   : > { %689 = dma.vmem_to_hbm [thread:$0]  (%p1106_p5), %s490_s12, 64, %s492_s1, %s1188_s19  }
 0x24f PF: > { %s503_s23 = sand.u32 1, %s974_s24   ;;  %p1252_p0 = scmp.ge.s32.totalorder %s986_s27, 2 }
 0x250   : > { %s504_s18 = scalar_lea.sflag [#allocation4], %s503_s23 }
 0x251   : > { %p705_p3 = pnand %p1252_p0, %p1072_p6 }
 0x253   : > { %p706_p7 = pneg %p705_p3 }
 0x255   : > { %965 = dma.done.wait (%p706_p7), %s504_s18, 64  }
 0x256   : > { %967 = vsyncadd (%p706_p7), %s504_s18, 4294967232  ;;  %s1253_s28 = sadd.s32 4294967294, %s986_s27  }
 0x257   : > { %s513_s17 = sand.u32 1, %s1253_s28  }
 0x258   : > { %s514_s15 = scalar_lea.sflag [#allocation10], %s513_s17 }
 0x259   : > { %969 = dma.done.wait (%p706_p7), %s514_s15, 128  }
 0x25a   : > { %971 = vsyncadd (%p706_p7), %s514_s15, 4294967168  ;;  %p25_p5 = scmp.ge.s32.totalorder %s1093_s22, 4   ;;  %s1254_s24 = smov %s978_s25 }
 0x25b   : > { %s1255_s25 = smov %s982_s26  ;;  %s1256_s26 = smov %s1102_s10 }
 0x25c   : > { %s1257_s27 = smov %s1093_s22  ;;  %27 = sbr.rel (!%p25_p5) target bundleno = 11 (0xb), region = 125 }
 0x261   :  { %530 = vsyncpa [#allocation3], 1 }
 0x262   :  { %532 = vsyncpa [#allocation3 + $0x1], 1 }
 0x263   :  { %533 = vsyncpa [#allocation6], 1 }
 0x264   :  { %534 = vsyncpa [#allocation4], 1 }
 0x265   :  { %536 = vsyncpa [#allocation4 + $0x1], 1 }
 0x266   :  { %537 = vsyncpa [#allocation10], 1 }
 0x267   :  { %539 = vsyncpa [#allocation10 + $0x1], 1 }

</bundles_post_ra>
